<compile_context>
chip_gen: v6e
topology: v6e:2x2x1
jax: 0.10.0
libtpu: 0.0.40
codegen_flags: <defaults>
</compile_context>

<pallas_src>
import functools
import math

import jax
import jax.numpy as jnp
from jax import lax
from jax.experimental import pallas as pl
from jax.experimental.pallas import tpu as pltpu


def _round_up(x, m):
    return (x + m - 1) // m * m


def _tpu_vmem_capacity_bytes(default=64 * 1024 * 1024):
    """Physical VMEM of the local TPU (128 MiB on v5e/v6e, 64 MiB on v7x)."""
    try:
        info = pltpu.get_tpu_info()
        cap = getattr(info, "vmem_capacity_bytes", None)
        if cap:
            return int(cap)
    except Exception:
        pass
    return default


# ---------------------------------------------------------------------------
# Path A: VMEM-resident table, chunked one-hot MXU gather (small vocabularies).
# ---------------------------------------------------------------------------
def _resident_gather_kernel(idx_ref, w_ref, out_ref, *scratch,
                            chunk, n_chunks, precision, unroll):
    # idx_ref: (TM, 1) int32 VMEM;  w_ref: (Vp, Dp) VMEM (resident);
    # out_ref: (TM, Dp);  scratch: optional (TM, Dp) f32 accumulator.
    #
    # NOTE: a one-hot matmul is not a true gather w.r.t. non-finite table
    # entries (0 * Inf/NaN = NaN pollutes every row of the tile); use the HBM
    # path if the table may contain non-finites.
    idx = idx_ref[...]                                   # (TM, 1)
    tm = out_ref.shape[0]

    def slab_dot(start):
        lanes = lax.broadcasted_iota(jnp.int32, (tm, chunk), 1) + start
        onehot = (lanes == idx).astype(w_ref.dtype)      # (TM, chunk), exact 0/1
        w_slab = w_ref[pl.ds(start, chunk), :]           # slice of resident table
        return jnp.dot(onehot, w_slab,
                       preferred_element_type=jnp.float32,
                       precision=precision)

    if n_chunks == 1:
        out_ref[...] = slab_dot(0).astype(out_ref.dtype)
    else:
        acc_ref = scratch[0]
        acc_ref[...] = jnp.zeros_like(acc_ref)

        def body(c, carry):
            start = pl.multiple_of(c * chunk, chunk)
            acc_ref[...] += slab_dot(start)
            return carry

        lax.fori_loop(0, n_chunks, body, 0, unroll=unroll)
        out_ref[...] = acc_ref[...].astype(out_ref.dtype)


def _lookup_resident(flat_idx, weight2d, block_rows, vmem_limit):
    v, d = weight2d.shape
    itemsize = weight2d.dtype.itemsize
    sub = max(8, 32 // itemsize)          # sublane multiple for packed dtypes
    dp = _round_up(d, 128)                # lane-dense output tiles
    chunk = min(512, _round_up(v, sub))   # bounded one-hot slab width
    vp = _round_up(v, chunk)
    n_chunks = vp // chunk

    w = weight2d
    if (vp, dp) != (v, d):
        w = jnp.pad(weight2d, ((0, vp - v), (0, dp - d)))

    n = flat_idx.shape[0]
    tm = min(block_rows, _round_up(n, 8))
    n_pad = _round_up(n, tm)
    idx = jnp.pad(flat_idx, (0, n_pad - n))[:, None]     # pads gather row 0
    grid = (n_pad // tm,)

    # Exactness: f32 tables need the multi-pass MXU path; bf16 one-hot gather
    # is already exact at default precision (3-6x less MXU work).
    precision = (lax.Precision.HIGHEST
                 if weight2d.dtype == jnp.float32 else None)
    kernel = functools.partial(_resident_gather_kernel, chunk=chunk,
                               n_chunks=n_chunks, precision=precision,
                               unroll=(n_chunks <= 16))
    scratch = [] if n_chunks == 1 else [pltpu.VMEM((tm, dp), jnp.float32)]

    # TODO(synk): single-buffer the resident table (constant index_map) via
    # pipeline_mode=pl.Buffered(1) once verified on all target runtimes; that
    # halves the dominant VMEM term and widens Path-A eligibility.
    out = pl.pallas_call(
        kernel,
        out_shape=jax.ShapeDtypeStruct((n_pad, dp), weight2d.dtype),
        grid_spec=pltpu.PrefetchScalarGridSpec(
            num_scalar_prefetch=0,
            grid=grid,
            in_specs=[
                pl.BlockSpec((tm, 1), lambda i: (i, 0)),    # index tile
                pl.BlockSpec((vp, dp), lambda i: (0, 0)),   # table stays resident
            ],
            out_specs=pl.BlockSpec((tm, dp), lambda i: (i, 0)),
            scratch_shapes=scratch,
        ),
        # TODO(synk): use pltpu.CORE_PARALLEL on v7x (2 TCs/chip) once gated on
        # detected generation; plain "parallel" is a no-op there.
        compiler_params=pltpu.CompilerParams(
            dimension_semantics=("parallel",),
            vmem_limit_bytes=vmem_limit,
        ),
    )(idx, w)
    return out[:n, :d]


# ---------------------------------------------------------------------------
# Path B: table stays in HBM, batched manual row DMAs (large vocabularies).
# ---------------------------------------------------------------------------
def _hbm_gather_kernel(idx_ref, w_hbm, out_ref, sems, *, tm, nsem, unroll):
    base = pl.program_id(0) * tm
    rows_per_sem = tm // nsem

    # Issue TM independent row copies straight into the output tile (no VMEM
    # bounce buffer).  The loop is partially unrolled: per-row issue cost
    # (SMEM idx load + address math + misc-slot descriptor push) dominates the
    # actual HBM traffic for ~KiB rows.
    def _start(r, carry):
        row = idx_ref[base + r]
        pltpu.make_async_copy(
            w_hbm.at[pl.ds(row, 1), :],
            out_ref.at[pl.ds(r, 1), :],
            sems.at[r % nsem],
        ).start()
        return carry

    lax.fori_loop(0, tm, _start, 0, unroll=unroll)

    # DMA semaphores count bytes and every row copy moves the same amount, so
    # one aggregate wait per semaphore (descriptor of tm//nsem rows) retires
    # all tm copies with nsem waits instead of tm.
    def _wait(s, carry):
        pltpu.make_async_copy(
            w_hbm.at[pl.ds(0, rows_per_sem), :],
            out_ref.at[pl.ds(0, rows_per_sem), :],
            sems.at[s],
        ).wait()
        return carry

    lax.fori_loop(0, nsem, _wait, 0, unroll=True)


def _lookup_hbm(flat_idx, weight2d, block_rows, vmem_limit, nsem=8,
                max_prefetch_idx=1 << 15):
    v, d = weight2d.shape
    n = flat_idx.shape[0]

    # SMEM guard: the scalar-prefetched index vector lives in SMEM; chunk very
    # long index streams so one call never prefetches more than 128 KiB.
    # TODO(synk): replace whole-index scalar prefetch with a per-tile SMEM
    # index BlockSpec to drop this cap and the extra concatenate pass.
    if n > max_prefetch_idx:
        outs = []
        for s in range(0, n, max_prefetch_idx):
            outs.append(
                _lookup_hbm(flat_idx[s:s + max_prefetch_idx], weight2d,
                            block_rows, vmem_limit, nsem, max_prefetch_idx))
        return jnp.concatenate(outs, axis=0)

    row_bytes = max(d * weight2d.dtype.itemsize, 1)
    tm = min(block_rows, _round_up(n, 8))
    # Only the double-buffered (tm, d) output tile lives in VMEM now (rows are
    # DMA'd straight into it); keep 2x headroom under the scoped limit.
    max_tm = max(8, (vmem_limit // (4 * row_bytes)) // 8 * 8)
    tm = min(tm, max_tm)
    nsem = min(nsem, tm)
    assert tm % nsem == 0
    n_pad = _round_up(n, tm)
    idx = jnp.pad(flat_idx, (0, n_pad - n))
    grid = (n_pad // tm,)

    kernel = functools.partial(_hbm_gather_kernel, tm=tm, nsem=nsem,
                               unroll=min(8, tm))
    out = pl.pallas_call(
        kernel,
        out_shape=jax.ShapeDtypeStruct((n_pad, d), weight2d.dtype),
        grid_spec=pltpu.PrefetchScalarGridSpec(
            num_scalar_prefetch=1,
            grid=grid,
            in_specs=[pl.BlockSpec(memory_space=pl.ANY)],    # table stays in HBM
            out_specs=pl.BlockSpec((tm, d), lambda i, idx_ref: (i, 0)),
            scratch_shapes=[pltpu.SemaphoreType.DMA((nsem,))],
        ),
        # TODO(synk): pltpu.CORE_PARALLEL on v7x to double DMA-issue throughput.
        compiler_params=pltpu.CompilerParams(
            dimension_semantics=("parallel",),
            vmem_limit_bytes=vmem_limit,
        ),
    )(idx, weight2d)
    return out[:n]


# ---------------------------------------------------------------------------
# Public wrapper matching LookupEmbedding.forward semantics.
# ---------------------------------------------------------------------------
def lookup_embedding(indices, weight, *, block_rows=256,
                     vmem_limit_bytes=None, resident_budget_bytes=None):
    """Gather rows of `weight` (num_embeddings, *embedding_dim) at integer
    `indices` of arbitrary shape; returns (*indices.shape, *embedding_dim)."""
    emb_shape = tuple(weight.shape[1:])
    v = weight.shape[0]
    d = int(math.prod(emb_shape)) if emb_shape else 1
    w2d = weight.reshape(v, d)

    flat_idx = indices.reshape(-1).astype(jnp.int32)
    # TODO(synk): PyTorch raises on out-of-range indices; we clamp instead
    # (no cheap in-kernel error path on TPU).
    flat_idx = jnp.clip(flat_idx, 0, v - 1)
    n = flat_idx.shape[0]
    out_shape = tuple(indices.shape) + emb_shape
    if n == 0:
        return jnp.zeros(out_shape, weight.dtype)

    # Generation-aware budgets: ~96 MiB scoped VMEM / ~56 MiB resident table
    # budget on 128-MiB parts (v5e/v6e), ~48 / ~24 MiB on v7x (64 MiB VMEM).
    cap = _tpu_vmem_capacity_bytes()
    if vmem_limit_bytes is None:
        vmem_limit_bytes = max(32 << 20, min(cap * 3 // 4, 96 << 20))
    if resident_budget_bytes is None:
        resident_budget_bytes = max(8 << 20, min(cap // 2 - (8 << 20), 56 << 20))

    itemsize = w2d.dtype.itemsize
    sub = max(8, 32 // itemsize)
    dp = _round_up(d, 128)
    chunk = min(512, _round_up(v, sub))
    vp = _round_up(v, chunk)
    tm = min(block_rows, _round_up(n, 8))
    # double-buffered resident table + double-buffered output tile
    # + bounded one-hot slab + f32 accumulator + index tiles.
    resident_bytes = (2 * vp * dp * itemsize + 2 * tm * dp * itemsize
                      + tm * chunk * max(itemsize, 4) + tm * dp * 4
                      + 2 * tm * 4)

    # TODO(synk): add a v5e-specific (128x128 MXU) FLOP-based cutoff and an
    # int8 one-hot variant for f32 tables on v5e/v6e (not v7x: fp8-only MXU).
    if resident_bytes <= resident_budget_bytes:
        out2d = _lookup_resident(flat_idx, w2d, block_rows, vmem_limit_bytes)
    else:
        out2d = _lookup_hbm(flat_idx, w2d, block_rows, vmem_limit_bytes)
    return out2d.reshape(out_shape)


if __name__ == "__main__":
    key = jax.random.PRNGKey(0)
    k_w, k_i = jax.random.split(key)

    num_embeddings = 16
    embedding_dim = 128          # int embedding_dim -> (H,) tail shape
    batch, seq = 2, 8            # indices of shape (*,) = (2, 8)

    # reset_parameters() zero-fills, which would make the test trivial; use
    # random weights as if passed via `_weight`.
    weight = jax.random.normal(k_w, (num_embeddings, embedding_dim),
                               dtype=jnp.float32)
    indices = jax.random.randint(k_i, (batch, seq), 0, num_embeddings,
                                 dtype=jnp.int32)
    flat = indices.reshape(-1)
    ref = jnp.take(weight, flat, axis=0).reshape(batch, seq, embedding_dim)

    # Path A (VMEM-resident one-hot MXU gather) via the public wrapper.
    out = jax.block_until_ready(lookup_embedding(indices, weight))
    assert out.shape == (batch, seq, embedding_dim)
    assert out.dtype == weight.dtype
    assert jnp.allclose(out, ref, rtol=1e-6, atol=1e-6)

    # Path B (HBM table, rows DMA'd straight into the output tile) exercised
    # explicitly, since the small demo table would otherwise stay resident.
    out_hbm = jax.block_until_ready(
        _lookup_hbm(flat, weight, 256, 32 * 1024 * 1024))
    assert out_hbm.shape == (batch * seq, embedding_dim)
    assert jnp.allclose(out_hbm, ref.reshape(batch * seq, embedding_dim))

    # bf16 table through the wrapper (default-precision MXU gather is exact).
    wbf16 = weight.astype(jnp.bfloat16)
    out_bf16 = jax.block_until_ready(lookup_embedding(indices, wbf16))
    assert jnp.array_equal(
        out_bf16,
        jnp.take(wbf16, flat, axis=0).reshape(batch, seq, embedding_dim))

    print("KERNEL_OK")
</pallas_src>

<mosaic_0001>
module attributes {stable_mosaic.version = 11 : i64} {
  func.func @_resident_gather_kernel(%arg0: i32, %arg1: memref<16x1xi32, #tpu.memory_space<vmem>>, %arg2: memref<16x128xf32, #tpu.memory_space<vmem>>, %arg3: memref<16x128xf32, #tpu.memory_space<vmem>>) attributes {dimension_semantics = [#tpu.dimension_semantics<parallel>], iteration_bounds = array<i64: 1>, scalar_prefetch = 0 : i64, scratch_operands = 0 : i64, tpu.core_type = #tpu.core_type<tc>, window_params = [{transform_indices = @transform_0, window_bounds = array<i64: 16, 1>}, {pipeline_mode = #tpu.pipeline_mode<synchronous>, transform_indices = @transform_1, window_bounds = array<i64: 16, 128>}, {transform_indices = @transform_2, window_bounds = array<i64: 16, 128>}]} {
    %c0 = arith.constant 0 : index
    %c0_0 = arith.constant 0 : index
    %0 = vector.load %arg1[%c0, %c0_0] : memref<16x1xi32, #tpu.memory_space<vmem>>, vector<16x1xi32>
    %1 = tpu.iota {dimensions = array<i32: 1>} : vector<16x16xi32>
    %c0_i32 = arith.constant 0 : i32
    %2 = vector.broadcast %c0_i32 : i32 to vector<16x16xi32>
    %3 = arith.addi %1, %2 : vector<16x16xi32>
    %4 = vector.broadcast %0 : vector<16x1xi32> to vector<16x16xi32>
    %5 = arith.cmpi eq, %3, %4 : vector<16x16xi32>
    %6 = arith.extui %5 : vector<16x16xi1> to vector<16x16xi32>
    %7 = arith.sitofp %6 : vector<16x16xi32> to vector<16x16xf32>
    %c0_1 = arith.constant 0 : index
    %c0_2 = arith.constant 0 : index
    %8 = vector.load %arg2[%c0_1, %c0_2] : memref<16x128xf32, #tpu.memory_space<vmem>>, vector<16x128xf32>
    %cst = arith.constant dense<0.000000e+00> : vector<16x128xf32>
    %9 = tpu.matmul %7, %8, %cst {dimension_numbers = #tpu.dot_dimension_numbers<[1], [0], [0], [1], [0, 0, 1, 1], [], []>, precision = #tpu.contract_precision<fp32>} : vector<16x16xf32>, vector<16x128xf32>, vector<16x128xf32> -> vector<16x128xf32>
    %c0_3 = arith.constant 0 : index
    %c0_4 = arith.constant 0 : index
    %10 = vector.load %arg3[%c0_3, %c0_4] : memref<16x128xf32, #tpu.memory_space<vmem>>, vector<16x128xf32>
    tpu.vector_store %arg3[%c0_3, %c0_4], %9 {strides = array<i32>} : memref<16x128xf32, #tpu.memory_space<vmem>>, vector<16x128xf32>,
    return
  }
  func.func @transform_0(%arg0: i32) -> (i32, i32) {
    %c0_i32 = arith.constant 0 : i32
    %c0_i32_0 = arith.constant 0 : i32
    return %arg0, %c0_i32 : i32, i32
  }
  func.func @transform_1(%arg0: i32) -> (i32, i32) {
    %c0_i32 = arith.constant 0 : i32
    %c0_i32_0 = arith.constant 0 : i32
    %c0_i32_1 = arith.constant 0 : i32
    return %c0_i32, %c0_i32_0 : i32, i32
  }
  func.func @transform_2(%arg0: i32) -> (i32, i32) {
    %c0_i32 = arith.constant 0 : i32
    %c0_i32_0 = arith.constant 0 : i32
    return %arg0, %c0_i32 : i32, i32
  }
}

</mosaic_0001>

<bundles_post_ra>
// kernel: tpu_custom_call.1
= control target key start
LH: loop header
LB: loop body
LE: loop exit
PB: predicated region body
PF: predicated region fallthrough
CT: control target
= control target key end

     0   :  { %v659_v2 = vmov 0   ;;  %s702_s0 = inlined_call_operand.vmem [shape: s32[16,1], index: 0, kind: input, shape index: {}]   ;;  %s703_s1 = inlined_call_operand.vmem [shape: f32[16,128], index: 1, kind: input, shape index: {}]   ;;  %s704_s2 = inlined_call_operand.hbm [shape: f32[16,128], index: 2, kind: output, shape index: {}]  }
   0x1   :  { %v12_v0 = vld [vmem:[%s702_s0] sm:$0xff]  ;;  %v29_v1 = vld [vmem:[%s703_s1 + $0x8] sm:$0xff]  ;;  %636 = vset.pattern.permute.xlu0 %v659_v2 }
   0x2   :  { %v66_v3 = vand.u32 4294901760, %v29_v1  ;;  %v28_v4 = vld [vmem:[%s703_s1] sm:$0xff] }
   0x3   :  { %7 = vsyncpa [#allocation3], 0  ;;  %17 = vperm.xlu0 %636, %v12_v0   ;;  %v69_v5 = vand.u32 4294901760, %v28_v4  ;;  %v13_v6 = vld [vmem:[%s702_s0 + $0x8] sm:$0xff]  ;;  %v14_v15 = vlaneseq  ;;  %vm30_vm0 = vcmask 130048   ;;  %v660_v18 = vmov 0.0  }
   0x4   :  { %v154_v7 = vsub.f32 %v29_v1, %v66_v3  ;;  %589 = vmatprep.subr.mxu0 %v66_v3  ;;  %s661_s0 = smov [#allocation2]  }
   0x5   :  { %v161_v8 = vsub.f32 %v28_v4, %v69_v5  ;;  %590 = vmatpush3.msra.mxu0 %v66_v3  ;;  %v15_v16 = vand.u32 127, %v14_v15  ;;  %s546_s1 = sshll.u32 %s661_s0, 4  ;;  %s547_s1 = int_to_ptr.vmem [resolvable:$true] %s546_s1 }
   0x6   :  { %v155_v9 = vand.u32 4294901760, %v154_v7  ;;  %591 = vmatprep.subr.mxu0 %v69_v5  ;;  %s637_s17 = scalar_lea.vmem %s547_s1, 256  ;;  %p642_p1 = scmp.lt.s32.totalorder %s547_s1, %s547_s1 }
   0x7   :  { %20 = vperm.xlu0 %636, %v13_v6   ;;  %v162_v10 = vand.u32 4294901760, %v161_v8  ;;  %592 = vmatpush3.msra.mxu0 %v69_v5  ;;  %p638_p0 = scmp.ne.s32.totalorder %s547_s1, %s637_s17  ;;  %p643_p2 = scmp.lt.s32.totalorder %s637_s17, %s637_s17 }
   0x8   :  { %v156_v11 = vsub.f32 %v154_v7, %v155_v9  ;;  %603 = vmatprep.subr.mxu0 %v154_v7 }
   0x9   :  { %v163_v12 = vsub.f32 %v161_v8, %v162_v10  ;;  %p644_p3 = por %p643_p2, %p642_p1 }
   0xa   :  { %v157_v13 = vand.u32 4294901760, %v156_v11 }
   0xb   :  { %v164_v14 = vand.u32 4294901760, %v163_v12  ;;  %p645_p4 = pnand %p644_p3, %p638_p0 }
   0xc   :  { %596 = vmatprep.subr.mxu1 %v157_v13 }
   0xd   :  { %597 = vmatpush3.msra.mxu1 %v157_v13 }
   0xe   :  { %598 = vmatprep.subr.mxu1 %v164_v14 }
   0xf   :  { %599 = vmatpush3.msra.mxu1 %v164_v14 }
  0x10   :  { %610 = vmatprep.subr.mxu1 %v66_v3 }
  0x7e   :  { %v18_v17 = vpop.permute.xlu0 %17 }
  0x7f   :  { %vm22_vm1 = vcmp.eq.s32.totalorder %v15_v16, %v18_v17 }
  0x80   :  { %v557_v19 = vsel %vm22_vm1, 1.0, %v660_v18 }
  0x81   :  { %v32_v20 = vsel %vm30_vm0, %v557_v19, 0  ;;  %600 = vmatprep.mubr.msk.f32.mxu1 %vm30_vm0, %v557_v19 }
  0x82   :  { %v105_v21 = vsub.f32 %v32_v20, %v32_v20  ;;  %v21_v22 = vpop.permute.xlu0 %20 }
  0x83   :  { %vm23_vm2 = vcmp.eq.s32.totalorder %v15_v16, %v21_v22 }
  0x84   :  { %v558_v23 = vsel %vm23_vm2, 1.0, %v660_v18  ;;  %v106_v24 = vand.u32 4294901760, %v105_v21 }
  0x85   :  { %v35_v25 = vsel %vm30_vm0, %v558_v23, 0  ;;  %601 = vmatmul.mubr.msk.f32.vlgmr.msra.gmra.mxu1 %vm30_vm0, %v558_v23 }
  0x86   :  { %v115_v26 = vsub.f32 %v35_v25, %v35_v25  ;;  %614 = vmatprep.mubr.f32.mxu1 %v106_v24  ;;  %611 = vmatpush3.msra.mxu1 %v66_v3  ;;  %v107_v27 = vsub.f32 %v105_v21, %v106_v24 }
  0x87   :  { %612 = vmatprep.subr.mxu1 %v69_v5 }
  0x88   :  { %613 = vmatpush3.msra.mxu1 %v69_v5  ;;  %v108_v28 = vand.u32 4294901760, %v107_v27  ;;  %v116_v29 = vand.u32 4294901760, %v115_v26 }
  0x89   :  { %624 = vmatprep.subr.mxu1 %v66_v3 }
  0x8a   :  { %593 = vmatprep.mubr.f32.mxu0 %v108_v28  ;;  %615 = vmatmul.mubr.f32.vlgmr.msra.gmra.mxu1 %v116_v29  ;;  %v117_v30 = vsub.f32 %v115_v26, %v116_v29 }
  0x8b   :  { %625 = vmatpush3.msra.mxu1 %v66_v3  ;;  %628 = vmatprep.mubr.msk.f32.mxu1 %vm30_vm0, %v557_v19 }
  0x8c   :  { %626 = vmatprep.subr.mxu1 %v69_v5  ;;  %v118_v31 = vand.u32 4294901760, %v117_v30 }
  0x8d   :  { %627 = vmatpush3.msra.mxu1 %v69_v5 }
  0x8e   :  { %594 = vmatmul.mubr.f32.vlgmr.msra.gmra.mxu0 %v118_v31  ;;  %629 = vmatmul.mubr.msk.f32.vlgmr.msra.gmra.mxu1 %vm30_vm0, %v558_v23 }
  0x8f   :  { %604 = vmatpush3.msra.mxu0 %v154_v7  ;;  %607 = vmatprep.mubr.f32.mxu0 %v105_v21 }
  0x90   :  { %605 = vmatprep.subr.mxu0 %v161_v8 }
  0x91   :  { %606 = vmatpush3.msra.mxu0 %v161_v8 }
  0x92   :  { %617 = vmatprep.subr.mxu0 %v155_v9  ;;  %608 = vmatmul.mubr.f32.vlgmr.msra.gmra.mxu0 %v115_v26 }
  0x93   :  { %618 = vmatpush3.msra.mxu0 %v155_v9  ;;  %621 = vmatprep.mubr.msk.f32.mxu0 %vm30_vm0, %v557_v19 }
  0x94   :  { %619 = vmatprep.subr.mxu0 %v162_v10 }
  0x95   :  { %620 = vmatpush3.msra.mxu0 %v162_v10 }
  0x96   :  { %622 = vmatmul.mubr.msk.f32.vlgmr.msra.gmra.mxu0 %vm30_vm0, %v558_v23 }
 0x145   :  { %v602_v32 = vpop.f32.mrf.mxu1 }
 0x147   :  { %v201_v33 = vpop.f32.mrf.mxu1 }
 0x14a   :  { %v616_v34 = vpop.f32.mrf.mxu1 }
 0x14c   :  { %v365_v38 = vpop.f32.mrf.mxu1 }
 0x14e   :  { %v595_v35 = vpop.f32.mrf.mxu0  ;;  %v630_v45 = vpop.f32.mrf.mxu1 }
 0x14f   :  { %v208_v37 = vadd.f32 %v602_v32, %v595_v35 }
 0x150   :  { %v110_v36 = vpop.f32.mrf.mxu0  ;;  %v529_v52 = vpop.f32.mrf.mxu1 }
 0x151   :  { %v202_v40 = vadd.f32 %v201_v33, %v110_v36 }
 0x152   :  { %v609_v39 = vpop.f32.mrf.mxu0 }
 0x153   :  { %v291_v41 = vadd.f32 %v609_v39, %v208_v37 }
 0x154   :  { %v283_v42 = vpop.f32.mrf.mxu0 }
 0x155   :  { %v284_v43 = vadd.f32 %v283_v42, %v202_v40  ;;  %v374_v44 = vadd.f32 %v616_v34, %v291_v41 }
 0x156   :  { %v623_v46 = vpop.f32.mrf.mxu0 }
 0x157   :  { %v457_v47 = vadd.f32 %v623_v46, %v374_v44  ;;  %v366_v48 = vadd.f32 %v365_v38, %v284_v43 }
 0x158   :  { %v450_v49 = vpop.f32.mrf.mxu0 }
 0x159   :  { %v536_v50 = vadd.f32 %v630_v45, %v457_v47  ;;  %v451_v51 = vadd.f32 %v450_v49, %v366_v48 }
 0x15b   :  { %540 = vst [vmem:[#allocation2 + $0x8] sm:$0xff] %v536_v50  ;;  %v530_v53 = vadd.f32 %v529_v52, %v451_v51 }
 0x15d   :  { %539 = vst [vmem:[#allocation2] sm:$0xff] %v530_v53 }
 0x15e   :  { %648 = shalt.err (!%p645_p4)
}
 0x15f   :  { %s662_s18 = smov 128   ;;  %s663_s19 = smov 8  }
 0x160   :  { %552 = dma.vmem_to_hbm [thread:$0]  %s547_s1, 256, %s704_s2, [#allocation3], %s662_s18, %s662_s18, %s663_s19  }
 0x161   :  { %657 = dma.done.wait [#allocation3], 256  }
 0x162   :  { %658 = vsyncadd [#allocation3], 4294967040 }
 0x163   :  { %556 = vsyncpa [#allocation3], 1 }

</bundles_post_ra>
